<compile_context>
chip_gen: v5e
topology: v5e:2x2
jax: 0.10.0
libtpu: 0.0.40
codegen_flags: <defaults>
</compile_context>

<pallas_src>
import functools

import jax
import jax.numpy as jnp
from jax import lax
from jax.experimental import pallas as pl
from jax.experimental.pallas import tpu as pltpu

INPUT_SIZE = 20
HIDDEN = 5
OUT_FEATURES = 3


def _tree_sum(terms):
    """Balanced pairwise sum -> shorter VALU dependence chain than a fold."""
    terms = list(terms)
    while len(terms) > 1:
        nxt = []
        for a in range(0, len(terms) - 1, 2):
            nxt.append(terms[a] + terms[a + 1])
        if len(terms) % 2:
            nxt.append(terms[-1])
        terms = nxt
    return terms[0]


def lstm_kernel(x_ref, w_ih_t_ref, w_hh_t_ref, b_ref, w_out_t_ref, b_out_ref,
                out_ref, pre_ref, *, seq_len, batch, hidden):
    """Single-invocation kernel.

    x_ref       : (S*B, I)   f32   (wrapper-side reshape; layout plumbing)
    w_ih_t_ref  : (I, 4H)    f32   gate order (i, f, o, g); i/f/o cols * 0.5
    w_hh_t_ref  : (H, 4H)    f32   gate order (i, f, o, g); i/f/o cols * 0.5
    b_ref       : (1, 4H)    f32   b_ih + b_hh, same order/scaling
    w_out_t_ref : (H, O)     f32
    b_out_ref   : (1, O)     f32
    out_ref     : (B, O)     f32
    pre_ref     : (S*B, 4H)  f32 VMEM scratch (hoisted input projection)
    """
    H = hidden
    B = batch

    # Hoisted input projection: one MXU matmul, off the recurrent critical
    # path (the x-path has no dependence on h).
    pre_ref[...] = (jnp.dot(x_ref[...], w_ih_t_ref[...],
                            preferred_element_type=jnp.float32)
                    + b_ref[...])                      # (S*B, 4H)

    w_hh_t = w_hh_t_ref[...]                           # (H, 4H), vreg-resident

    h0 = jnp.zeros((B, H), jnp.float32)
    c0 = jnp.zeros((B, H), jnp.float32)

    def step(t, carry):
        h, c = carry
        row = pl.multiple_of(t * B, B)
        pre = pre_ref[pl.ds(row, B), :]                # (B, 4H)

        # Recurrent term h @ W_hh^T as H broadcast multiplies, combined with
        # the pre-activation via a balanced tree sum (VPU only; no MXU push
        # inside the serial dependence chain).
        prods = [h[:, k:k + 1] * w_hh_t[k:k + 1, :] for k in range(H)]
        gates = _tree_sum(prods + [pre])               # (B, 4H)

        # One EUP tanh over all 4H lanes.  i/f/o columns were pre-scaled by
        # 0.5 in the wrapper, so sigmoid(x) = 0.5*tanh(x/2) + 0.5 here.
        t_all = jnp.tanh(gates)
        sig = 0.5 * t_all[:, :3 * H] + 0.5             # i, f, o
        i_g = sig[:, 0 * H:1 * H]
        f_g = sig[:, 1 * H:2 * H]
        o_g = sig[:, 2 * H:3 * H]
        g_g = t_all[:, 3 * H:4 * H]                    # g (unscaled column)

        c_new = f_g * c + i_g * g_g
        h_new = o_g * jnp.tanh(c_new)
        return (h_new, c_new)

    # Trip count is a compile-time constant -> fully unroll so the scheduler
    # sees the whole chain; h/c stay resident in vregs.
    h, _ = lax.fori_loop(0, seq_len, step, (h0, c0), unroll=True)

    # Final linear layer on h_n[-1] (== h after the last timestep), done on
    # the VPU: 2x5x3 is far too small to justify an MXU round trip at the
    # tail of the serial chain.
    w_out_t = w_out_t_ref[...]                         # (H, O)
    out_terms = [h[:, k:k + 1] * w_out_t[k:k + 1, :] for k in range(H)]
    out_ref[...] = _tree_sum(out_terms + [b_out_ref[...]])


def lstm_forward(x, w_ih, w_hh, b_ih, b_hh, w_out, b_out):
    """x: (S, B, I) float. Returns (B, OUT_FEATURES) float32."""
    S, B, I = x.shape
    H = w_hh.shape[1]
    O = w_out.shape[0]
    # unroll=True + vreg-resident h/c require a static trip count.
    assert isinstance(S, int) and isinstance(B, int), "seq/batch must be static"

    def reorder_and_scale(a):
        # PyTorch gate order (i, f, g, o) -> kernel order (i, f, o, g),
        # with the sigmoid gates (i, f, o) pre-scaled by 0.5 so the kernel
        # can use a single tanh: sigmoid(x) = 0.5*tanh(x/2) + 0.5.
        i, f, g, o = jnp.split(jnp.asarray(a, jnp.float32), 4, axis=0)
        return jnp.concatenate([0.5 * i, 0.5 * f, 0.5 * o, g], axis=0)

    # Glue: reorder + rescale gates, pre-transpose weights, combine biases so
    # the kernel does plain (B, K) @ (K, N) work with a single tanh block.
    w_ih_t = reorder_and_scale(w_ih).T                   # (I, 4H)
    w_hh_t = reorder_and_scale(w_hh).T                   # (H, 4H)
    b = (reorder_and_scale(b_ih) + reorder_and_scale(b_hh)).reshape(1, 4 * H)
    w_out_t = jnp.asarray(w_out, jnp.float32).T          # (H, O)
    b_out2 = jnp.asarray(b_out, jnp.float32).reshape(1, O)

    x2d = jnp.asarray(x, jnp.float32).reshape(S * B, I)  # layout plumbing

    kernel = functools.partial(lstm_kernel, seq_len=S, batch=B, hidden=H)
    vmem = pltpu.MemorySpace.VMEM
    return pl.pallas_call(
        kernel,
        out_shape=jax.ShapeDtypeStruct((B, O), jnp.float32),
        in_specs=[pl.BlockSpec(memory_space=vmem)] * 6,
        out_specs=pl.BlockSpec(memory_space=vmem),
        scratch_shapes=[pltpu.VMEM((S * B, 4 * H), jnp.float32)],
    )(x2d, w_ih_t, w_hh_t, b, w_out_t, b_out2)


def lstm_reference(x, w_ih, w_hh, b_ih, b_hh, w_out, b_out):
    """Pure-JAX reference matching torch.nn.LSTM + Linear semantics."""
    S, B, I = x.shape
    H = w_hh.shape[1]
    h = jnp.zeros((B, H), jnp.float32)
    c = jnp.zeros((B, H), jnp.float32)

    def step(carry, x_t):
        h, c = carry
        gates = x_t @ w_ih.T + b_ih + h @ w_hh.T + b_hh
        i_g = jax.nn.sigmoid(gates[:, 0 * H:1 * H])
        f_g = jax.nn.sigmoid(gates[:, 1 * H:2 * H])
        g_g = jnp.tanh(gates[:, 2 * H:3 * H])
        o_g = jax.nn.sigmoid(gates[:, 3 * H:4 * H])
        c = f_g * c + i_g * g_g
        h = o_g * jnp.tanh(c)
        return (h, c), None

    (h, c), _ = lax.scan(step, (h, c), x)
    return h @ w_out.T + b_out


if __name__ == "__main__":
    key = jax.random.PRNGKey(0)
    ks = jax.random.split(key, 8)

    SEQ, BATCH = 8, 2
    H, I, O = HIDDEN, INPUT_SIZE, OUT_FEATURES
    bound_lstm = 1.0 / jnp.sqrt(H)
    bound_lin = 1.0 / jnp.sqrt(H)

    # Deterministic parameter init (same shapes as torch.nn.LSTM / Linear).
    w_ih = jax.random.uniform(ks[0], (4 * H, I), jnp.float32, -bound_lstm, bound_lstm)
    w_hh = jax.random.uniform(ks[1], (4 * H, H), jnp.float32, -bound_lstm, bound_lstm)
    b_ih = jax.random.uniform(ks[2], (4 * H,), jnp.float32, -bound_lstm, bound_lstm)
    b_hh = jax.random.uniform(ks[3], (4 * H,), jnp.float32, -bound_lstm, bound_lstm)
    w_out = jax.random.uniform(ks[4], (O, H), jnp.float32, -bound_lin, bound_lin)
    b_out = jax.random.uniform(ks[5], (O,), jnp.float32, -bound_lin, bound_lin)

    x = jax.random.uniform(ks[6], (SEQ, BATCH, I), jnp.float32)

    y = lstm_forward(x, w_ih, w_hh, b_ih, b_hh, w_out, b_out)
    y = jax.block_until_ready(y)

    y_ref = lstm_reference(x, w_ih, w_hh, b_ih, b_hh, w_out, b_out)
    assert y.shape == (BATCH, O), y.shape
    assert jnp.allclose(y, y_ref, atol=1e-4, rtol=1e-4), (y, y_ref)

    print("KERNEL_OK")
</pallas_src>

<mosaic_0001>
module attributes {stable_mosaic.version = 11 : i64} {
  func.func @lstm_kernel(%arg0: memref<16x20xf32, #tpu.memory_space<vmem>>, %arg1: memref<20x20xf32, #tpu.memory_space<vmem>>, %arg2: memref<5x20xf32, #tpu.memory_space<vmem>>, %arg3: memref<1x20xf32, #tpu.memory_space<vmem>>, %arg4: memref<5x3xf32, #tpu.memory_space<vmem>>, %arg5: memref<1x3xf32, #tpu.memory_space<vmem>>, %arg6: memref<2x3xf32, #tpu.memory_space<vmem>>, %arg7: memref<16x20xf32, #tpu.memory_space<vmem>>) attributes {dimension_semantics = [], scalar_prefetch = 0 : i64, scratch_operands = 1 : i64, tpu.core_type = #tpu.core_type<tc>} {
    %c0 = arith.constant 0 : index
    %c0_0 = arith.constant 0 : index
    %0 = vector.load %arg0[%c0, %c0_0] : memref<16x20xf32, #tpu.memory_space<vmem>>, vector<16x20xf32>
    %c0_1 = arith.constant 0 : index
    %c0_2 = arith.constant 0 : index
    %1 = vector.load %arg1[%c0_1, %c0_2] : memref<20x20xf32, #tpu.memory_space<vmem>>, vector<20x20xf32>
    %cst = arith.constant dense<0.000000e+00> : vector<16x20xf32>
    %2 = tpu.matmul %0, %1, %cst {dimension_numbers = #tpu.dot_dimension_numbers<[1], [0], [0], [1], [0, 0, 1, 1], [], []>} : vector<16x20xf32>, vector<20x20xf32>, vector<16x20xf32> -> vector<16x20xf32>
    %c0_3 = arith.constant 0 : index
    %c0_4 = arith.constant 0 : index
    %3 = vector.load %arg3[%c0_3, %c0_4] : memref<1x20xf32, #tpu.memory_space<vmem>>, vector<1x20xf32>
    %4 = vector.broadcast %3 : vector<1x20xf32> to vector<16x20xf32>
    %5 = arith.addf %2, %4 : vector<16x20xf32>
    %c0_5 = arith.constant 0 : index
    %c0_6 = arith.constant 0 : index
    %6 = vector.load %arg7[%c0_5, %c0_6] : memref<16x20xf32, #tpu.memory_space<vmem>>, vector<16x20xf32>
    tpu.vector_store %arg7[%c0_5, %c0_6], %5 {strides = array<i32>} : memref<16x20xf32, #tpu.memory_space<vmem>>, vector<16x20xf32>,
    %c0_7 = arith.constant 0 : index
    %c0_8 = arith.constant 0 : index
    %7 = vector.load %arg2[%c0_7, %c0_8] : memref<5x20xf32, #tpu.memory_space<vmem>>, vector<5x20xf32>
    %cst_9 = arith.constant 0.000000e+00 : f32
    %8 = vector.broadcast %cst_9 : f32 to vector<2x5xf32>
    %cst_10 = arith.constant 0.000000e+00 : f32
    %9 = vector.broadcast %cst_10 : f32 to vector<2x5xf32>
    %c0_i32 = arith.constant 0 : i32
    %c2_i32 = arith.constant 2 : i32
    %10 = arith.muli %c0_i32, %c2_i32 : i32
    %11 = tpu.assume_multiple %10, 2 : i32
    %12 = arith.index_cast %11 : i32 to index
    %c0_11 = arith.constant 0 : index
    %13 = vector.load %arg7[%12, %c0_11] : memref<16x20xf32, #tpu.memory_space<vmem>>, vector<2x20xf32>
    %14 = vector.extract_strided_slice %8 {offsets = [0, 0], sizes = [2, 1], strides = [1, 1]} : vector<2x5xf32> to vector<2x1xf32>
    %15 = vector.extract_strided_slice %7 {offsets = [0, 0], sizes = [1, 20], strides = [1, 1]} : vector<5x20xf32> to vector<1x20xf32>
    %16 = vector.broadcast %14 : vector<2x1xf32> to vector<2x20xf32>
    %17 = vector.broadcast %15 : vector<1x20xf32> to vector<2x20xf32>
    %18 = arith.mulf %16, %17 : vector<2x20xf32>
    %19 = vector.extract_strided_slice %8 {offsets = [0, 1], sizes = [2, 1], strides = [1, 1]} : vector<2x5xf32> to vector<2x1xf32>
    %20 = vector.extract_strided_slice %7 {offsets = [1, 0], sizes = [1, 20], strides = [1, 1]} : vector<5x20xf32> to vector<1x20xf32>
    %21 = vector.broadcast %19 : vector<2x1xf32> to vector<2x20xf32>
    %22 = vector.broadcast %20 : vector<1x20xf32> to vector<2x20xf32>
    %23 = arith.mulf %21, %22 : vector<2x20xf32>
    %24 = vector.extract_strided_slice %8 {offsets = [0, 2], sizes = [2, 1], strides = [1, 1]} : vector<2x5xf32> to vector<2x1xf32>
    %25 = vector.extract_strided_slice %7 {offsets = [2, 0], sizes = [1, 20], strides = [1, 1]} : vector<5x20xf32> to vector<1x20xf32>
    %26 = vector.broadcast %24 : vector<2x1xf32> to vector<2x20xf32>
    %27 = vector.broadcast %25 : vector<1x20xf32> to vector<2x20xf32>
    %28 = arith.mulf %26, %27 : vector<2x20xf32>
    %29 = vector.extract_strided_slice %8 {offsets = [0, 3], sizes = [2, 1], strides = [1, 1]} : vector<2x5xf32> to vector<2x1xf32>
    %30 = vector.extract_strided_slice %7 {offsets = [3, 0], sizes = [1, 20], strides = [1, 1]} : vector<5x20xf32> to vector<1x20xf32>
    %31 = vector.broadcast %29 : vector<2x1xf32> to vector<2x20xf32>
    %32 = vector.broadcast %30 : vector<1x20xf32> to vector<2x20xf32>
    %33 = arith.mulf %31, %32 : vector<2x20xf32>
    %34 = vector.extract_strided_slice %8 {offsets = [0, 4], sizes = [2, 1], strides = [1, 1]} : vector<2x5xf32> to vector<2x1xf32>
    %35 = vector.extract_strided_slice %7 {offsets = [4, 0], sizes = [1, 20], strides = [1, 1]} : vector<5x20xf32> to vector<1x20xf32>
    %36 = vector.broadcast %34 : vector<2x1xf32> to vector<2x20xf32>
    %37 = vector.broadcast %35 : vector<1x20xf32> to vector<2x20xf32>
    %38 = arith.mulf %36, %37 : vector<2x20xf32>
    %39 = arith.addf %18, %23 : vector<2x20xf32>
    %40 = arith.addf %28, %33 : vector<2x20xf32>
    %41 = arith.addf %38, %13 : vector<2x20xf32>
    %42 = arith.addf %39, %40 : vector<2x20xf32>
    %43 = arith.addf %42, %41 : vector<2x20xf32>
    %44 = math.tanh %43 : vector<2x20xf32>
    %45 = vector.extract_strided_slice %44 {offsets = [0, 0], sizes = [2, 15], strides = [1, 1]} : vector<2x20xf32> to vector<2x15xf32>
    %cst_12 = arith.constant 5.000000e-01 : f32
    %46 = vector.broadcast %cst_12 : f32 to vector<2x15xf32>
    %47 = arith.mulf %46, %45 : vector<2x15xf32>
    %cst_13 = arith.constant 5.000000e-01 : f32
    %48 = vector.broadcast %cst_13 : f32 to vector<2x15xf32>
    %49 = arith.addf %47, %48 : vector<2x15xf32>
    %50 = vector.extract_strided_slice %49 {offsets = [0, 0], sizes = [2, 5], strides = [1, 1]} : vector<2x15xf32> to vector<2x5xf32>
    %51 = vector.extract_strided_slice %49 {offsets = [0, 5], sizes = [2, 5], strides = [1, 1]} : vector<2x15xf32> to vector<2x5xf32>
    %52 = vector.extract_strided_slice %49 {offsets = [0, 10], sizes = [2, 5], strides = [1, 1]} : vector<2x15xf32> to vector<2x5xf32>
    %53 = vector.extract_strided_slice %44 {offsets = [0, 15], sizes = [2, 5], strides = [1, 1]} : vector<2x20xf32> to vector<2x5xf32>
    %54 = arith.mulf %51, %9 : vector<2x5xf32>
    %55 = arith.mulf %50, %53 : vector<2x5xf32>
    %56 = arith.addf %54, %55 : vector<2x5xf32>
    %57 = math.tanh %56 : vector<2x5xf32>
    %58 = arith.mulf %52, %57 : vector<2x5xf32>
    %c1_i32 = arith.constant 1 : i32
    %c2_i32_14 = arith.constant 2 : i32
    %59 = arith.muli %c1_i32, %c2_i32_14 : i32
    %60 = tpu.assume_multiple %59, 2 : i32
    %61 = arith.index_cast %60 : i32 to index
    %c0_15 = arith.constant 0 : index
    %62 = vector.load %arg7[%61, %c0_15] : memref<16x20xf32, #tpu.memory_space<vmem>>, vector<2x20xf32>
    %63 = vector.extract_strided_slice %58 {offsets = [0, 0], sizes = [2, 1], strides = [1, 1]} : vector<2x5xf32> to vector<2x1xf32>
    %64 = vector.extract_strided_slice %7 {offsets = [0, 0], sizes = [1, 20], strides = [1, 1]} : vector<5x20xf32> to vector<1x20xf32>
    %65 = vector.broadcast %63 : vector<2x1xf32> to vector<2x20xf32>
    %66 = vector.broadcast %64 : vector<1x20xf32> to vector<2x20xf32>
    %67 = arith.mulf %65, %66 : vector<2x20xf32>
    %68 = vector.extract_strided_slice %58 {offsets = [0, 1], sizes = [2, 1], strides = [1, 1]} : vector<2x5xf32> to vector<2x1xf32>
    %69 = vector.extract_strided_slice %7 {offsets = [1, 0], sizes = [1, 20], strides = [1, 1]} : vector<5x20xf32> to vector<1x20xf32>
    %70 = vector.broadcast %68 : vector<2x1xf32> to vector<2x20xf32>
    %71 = vector.broadcast %69 : vector<1x20xf32> to vector<2x20xf32>
    %72 = arith.mulf %70, %71 : vector<2x20xf32>
    %73 = vector.extract_strided_slice %58 {offsets = [0, 2], sizes = [2, 1], strides = [1, 1]} : vector<2x5xf32> to vector<2x1xf32>
    %74 = vector.extract_strided_slice %7 {offsets = [2, 0], sizes = [1, 20], strides = [1, 1]} : vector<5x20xf32> to vector<1x20xf32>
    %75 = vector.broadcast %73 : vector<2x1xf32> to vector<2x20xf32>
    %76 = vector.broadcast %74 : vector<1x20xf32> to vector<2x20xf32>
    %77 = arith.mulf %75, %76 : vector<2x20xf32>
    %78 = vector.extract_strided_slice %58 {offsets = [0, 3], sizes = [2, 1], strides = [1, 1]} : vector<2x5xf32> to vector<2x1xf32>
    %79 = vector.extract_strided_slice %7 {offsets = [3, 0], sizes = [1, 20], strides = [1, 1]} : vector<5x20xf32> to vector<1x20xf32>
    %80 = vector.broadcast %78 : vector<2x1xf32> to vector<2x20xf32>
    %81 = vector.broadcast %79 : vector<1x20xf32> to vector<2x20xf32>
    %82 = arith.mulf %80, %81 : vector<2x20xf32>
    %83 = vector.extract_strided_slice %58 {offsets = [0, 4], sizes = [2, 1], strides = [1, 1]} : vector<2x5xf32> to vector<2x1xf32>
    %84 = vector.extract_strided_slice %7 {offsets = [4, 0], sizes = [1, 20], strides = [1, 1]} : vector<5x20xf32> to vector<1x20xf32>
    %85 = vector.broadcast %83 : vector<2x1xf32> to vector<2x20xf32>
    %86 = vector.broadcast %84 : vector<1x20xf32> to vector<2x20xf32>
    %87 = arith.mulf %85, %86 : vector<2x20xf32>
    %88 = arith.addf %67, %72 : vector<2x20xf32>
    %89 = arith.addf %77, %82 : vector<2x20xf32>
    %90 = arith.addf %87, %62 : vector<2x20xf32>
    %91 = arith.addf %88, %89 : vector<2x20xf32>
    %92 = arith.addf %91, %90 : vector<2x20xf32>
    %93 = math.tanh %92 : vector<2x20xf32>
    %94 = vector.extract_strided_slice %93 {offsets = [0, 0], sizes = [2, 15], strides = [1, 1]} : vector<2x20xf32> to vector<2x15xf32>
    %cst_16 = arith.constant 5.000000e-01 : f32
    %95 = vector.broadcast %cst_16 : f32 to vector<2x15xf32>
    %96 = arith.mulf %95, %94 : vector<2x15xf32>
    %cst_17 = arith.constant 5.000000e-01 : f32
    %97 = vector.broadcast %cst_17 : f32 to vector<2x15xf32>
    %98 = arith.addf %96, %97 : vector<2x15xf32>
    %99 = vector.extract_strided_slice %98 {offsets = [0, 0], sizes = [2, 5], strides = [1, 1]} : vector<2x15xf32> to vector<2x5xf32>
    %100 = vector.extract_strided_slice %98 {offsets = [0, 5], sizes = [2, 5], strides = [1, 1]} : vector<2x15xf32> to vector<2x5xf32>
    %101 = vector.extract_strided_slice %98 {offsets = [0, 10], sizes = [2, 5], strides = [1, 1]} : vector<2x15xf32> to vector<2x5xf32>
    %102 = vector.extract_strided_slice %93 {offsets = [0, 15], sizes = [2, 5], strides = [1, 1]} : vector<2x20xf32> to vector<2x5xf32>
    %103 = arith.mulf %100, %56 : vector<2x5xf32>
    %104 = arith.mulf %99, %102 : vector<2x5xf32>
    %105 = arith.addf %103, %104 : vector<2x5xf32>
    %106 = math.tanh %105 : vector<2x5xf32>
    %107 = arith.mulf %101, %106 : vector<2x5xf32>
    %c2_i32_18 = arith.constant 2 : i32
    %c2_i32_19 = arith.constant 2 : i32
    %108 = arith.muli %c2_i32_18, %c2_i32_19 : i32
    %109 = tpu.assume_multiple %108, 2 : i32
    %110 = arith.index_cast %109 : i32 to index
    %c0_20 = arith.constant 0 : index
    %111 = vector.load %arg7[%110, %c0_20] : memref<16x20xf32, #tpu.memory_space<vmem>>, vector<2x20xf32>
    %112 = vector.extract_strided_slice %107 {offsets = [0, 0], sizes = [2, 1], strides = [1, 1]} : vector<2x5xf32> to vector<2x1xf32>
    %113 = vector.extract_strided_slice %7 {offsets = [0, 0], sizes = [1, 20], strides = [1, 1]} : vector<5x20xf32> to vector<1x20xf32>
    %114 = vector.broadcast %112 : vector<2x1xf32> to vector<2x20xf32>
    %115 = vector.broadcast %113 : vector<1x20xf32> to vector<2x20xf32>
    %116 = arith.mulf %114, %115 : vector<2x20xf32>
    %117 = vector.extract_strided_slice %107 {offsets = [0, 1], sizes = [2, 1], strides = [1, 1]} : vector<2x5xf32> to vector<2x1xf32>
    %118 = vector.extract_strided_slice %7 {offsets = [1, 0], sizes = [1, 20], strides = [1, 1]} : vector<5x20xf32> to vector<1x20xf32>
    %119 = vector.broadcast %117 : vector<2x1xf32> to vector<2x20xf32>
    %120 = vector.broadcast %118 : vector<1x20xf32> to vector<2x20xf32>
    %121 = arith.mulf %119, %120 : vector<2x20xf32>
    %122 = vector.extract_strided_slice %107 {offsets = [0, 2], sizes = [2, 1], strides = [1, 1]} : vector<2x5xf32> to vector<2x1xf32>
    %123 = vector.extract_strided_slice %7 {offsets = [2, 0], sizes = [1, 20], strides = [1, 1]} : vector<5x20xf32> to vector<1x20xf32>
    %124 = vector.broadcast %122 : vector<2x1xf32> to vector<2x20xf32>
    %125 = vector.broadcast %123 : vector<1x20xf32> to vector<2x20xf32>
    %126 = arith.mulf %124, %125 : vector<2x20xf32>
    %127 = vector.extract_strided_slice %107 {offsets = [0, 3], sizes = [2, 1], strides = [1, 1]} : vector<2x5xf32> to vector<2x1xf32>
    %128 = vector.extract_strided_slice %7 {offsets = [3, 0], sizes = [1, 20], strides = [1, 1]} : vector<5x20xf32> to vector<1x20xf32>
    %129 = vector.broadcast %127 : vector<2x1xf32> to vector<2x20xf32>
    %130 = vector.broadcast %128 : vector<1x20xf32> to vector<2x20xf32>
    %131 = arith.mulf %129, %130 : vector<2x20xf32>
    %132 = vector.extract_strided_slice %107 {offsets = [0, 4], sizes = [2, 1], strides = [1, 1]} : vector<2x5xf32> to vector<2x1xf32>
    %133 = vector.extract_strided_slice %7 {offsets = [4, 0], sizes = [1, 20], strides = [1, 1]} : vector<5x20xf32> to vector<1x20xf32>
    %134 = vector.broadcast %132 : vector<2x1xf32> to vector<2x20xf32>
    %135 = vector.broadcast %133 : vector<1x20xf32> to vector<2x20xf32>
    %136 = arith.mulf %134, %135 : vector<2x20xf32>
    %137 = arith.addf %116, %121 : vector<2x20xf32>
    %138 = arith.addf %126, %131 : vector<2x20xf32>
    %139 = arith.addf %136, %111 : vector<2x20xf32>
    %140 = arith.addf %137, %138 : vector<2x20xf32>
    %141 = arith.addf %140, %139 : vector<2x20xf32>
    %142 = math.tanh %141 : vector<2x20xf32>
    %143 = vector.extract_strided_slice %142 {offsets = [0, 0], sizes = [2, 15], strides = [1, 1]} : vector<2x20xf32> to vector<2x15xf32>
    %cst_21 = arith.constant 5.000000e-01 : f32
    %144 = vector.broadcast %cst_21 : f32 to vector<2x15xf32>
    %145 = arith.mulf %144, %143 : vector<2x15xf32>
    %cst_22 = arith.constant 5.000000e-01 : f32
    %146 = vector.broadcast %cst_22 : f32 to vector<2x15xf32>
    %147 = arith.addf %145, %146 : vector<2x15xf32>
    %148 = vector.extract_strided_slice %147 {offsets = [0, 0], sizes = [2, 5], strides = [1, 1]} : vector<2x15xf32> to vector<2x5xf32>
    %149 = vector.extract_strided_slice %147 {offsets = [0, 5], sizes = [2, 5], strides = [1, 1]} : vector<2x15xf32> to vector<2x5xf32>
    %150 = vector.extract_strided_slice %147 {offsets = [0, 10], sizes = [2, 5], strides = [1, 1]} : vector<2x15xf32> to vector<2x5xf32>
    %151 = vector.extract_strided_slice %142 {offsets = [0, 15], sizes = [2, 5], strides = [1, 1]} : vector<2x20xf32> to vector<2x5xf32>
    %152 = arith.mulf %149, %105 : vector<2x5xf32>
    %153 = arith.mulf %148, %151 : vector<2x5xf32>
    %154 = arith.addf %152, %153 : vector<2x5xf32>
    %155 = math.tanh %154 : vector<2x5xf32>
    %156 = arith.mulf %150, %155 : vector<2x5xf32>
    %c3_i32 = arith.constant 3 : i32
    %c2_i32_23 = arith.constant 2 : i32
    %157 = arith.muli %c3_i32, %c2_i32_23 : i32
    %158 = tpu.assume_multiple %157, 2 : i32
    %159 = arith.index_cast %158 : i32 to index
    %c0_24 = arith.constant 0 : index
    %160 = vector.load %arg7[%159, %c0_24] : memref<16x20xf32, #tpu.memory_space<vmem>>, vector<2x20xf32>
    %161 = vector.extract_strided_slice %156 {offsets = [0, 0], sizes = [2, 1], strides = [1, 1]} : vector<2x5xf32> to vector<2x1xf32>
    %162 = vector.extract_strided_slice %7 {offsets = [0, 0], sizes = [1, 20], strides = [1, 1]} : vector<5x20xf32> to vector<1x20xf32>
    %163 = vector.broadcast %161 : vector<2x1xf32> to vector<2x20xf32>
    %164 = vector.broadcast %162 : vector<1x20xf32> to vector<2x20xf32>
    %165 = arith.mulf %163, %164 : vector<2x20xf32>
    %166 = vector.extract_strided_slice %156 {offsets = [0, 1], sizes = [2, 1], strides = [1, 1]} : vector<2x5xf32> to vector<2x1xf32>
    %167 = vector.extract_strided_slice %7 {offsets = [1, 0], sizes = [1, 20], strides = [1, 1]} : vector<5x20xf32> to vector<1x20xf32>
    %168 = vector.broadcast %166 : vector<2x1xf32> to vector<2x20xf32>
    %169 = vector.broadcast %167 : vector<1x20xf32> to vector<2x20xf32>
    %170 = arith.mulf %168, %169 : vector<2x20xf32>
    %171 = vector.extract_strided_slice %156 {offsets = [0, 2], sizes = [2, 1], strides = [1, 1]} : vector<2x5xf32> to vector<2x1xf32>
    %172 = vector.extract_strided_slice %7 {offsets = [2, 0], sizes = [1, 20], strides = [1, 1]} : vector<5x20xf32> to vector<1x20xf32>
    %173 = vector.broadcast %171 : vector<2x1xf32> to vector<2x20xf32>
    %174 = vector.broadcast %172 : vector<1x20xf32> to vector<2x20xf32>
    %175 = arith.mulf %173, %174 : vector<2x20xf32>
    %176 = vector.extract_strided_slice %156 {offsets = [0, 3], sizes = [2, 1], strides = [1, 1]} : vector<2x5xf32> to vector<2x1xf32>
    %177 = vector.extract_strided_slice %7 {offsets = [3, 0], sizes = [1, 20], strides = [1, 1]} : vector<5x20xf32> to vector<1x20xf32>
    %178 = vector.broadcast %176 : vector<2x1xf32> to vector<2x20xf32>
    %179 = vector.broadcast %177 : vector<1x20xf32> to vector<2x20xf32>
    %180 = arith.mulf %178, %179 : vector<2x20xf32>
    %181 = vector.extract_strided_slice %156 {offsets = [0, 4], sizes = [2, 1], strides = [1, 1]} : vector<2x5xf32> to vector<2x1xf32>
    %182 = vector.extract_strided_slice %7 {offsets = [4, 0], sizes = [1, 20], strides = [1, 1]} : vector<5x20xf32> to vector<1x20xf32>
    %183 = vector.broadcast %181 : vector<2x1xf32> to vector<2x20xf32>
    %184 = vector.broadcast %182 : vector<1x20xf32> to vector<2x20xf32>
    %185 = arith.mulf %183, %184 : vector<2x20xf32>
    %186 = arith.addf %165, %170 : vector<2x20xf32>
    %187 = arith.addf %175, %180 : vector<2x20xf32>
    %188 = arith.addf %185, %160 : vector<2x20xf32>
    %189 = arith.addf %186, %187 : vector<2x20xf32>
    %190 = arith.addf %189, %188 : vector<2x20xf32>
    %191 = math.tanh %190 : vector<2x20xf32>
    %192 = vector.extract_strided_slice %191 {offsets = [0, 0], sizes = [2, 15], strides = [1, 1]} : vector<2x20xf32> to vector<2x15xf32>
    %cst_25 = arith.constant 5.000000e-01 : f32
    %193 = vector.broadcast %cst_25 : f32 to vector<2x15xf32>
    %194 = arith.mulf %193, %192 : vector<2x15xf32>
    %cst_26 = arith.constant 5.000000e-01 : f32
    %195 = vector.broadcast %cst_26 : f32 to vector<2x15xf32>
    %196 = arith.addf %194, %195 : vector<2x15xf32>
    %197 = vector.extract_strided_slice %196 {offsets = [0, 0], sizes = [2, 5], strides = [1, 1]} : vector<2x15xf32> to vector<2x5xf32>
    %198 = vector.extract_strided_slice %196 {offsets = [0, 5], sizes = [2, 5], strides = [1, 1]} : vector<2x15xf32> to vector<2x5xf32>
    %199 = vector.extract_strided_slice %196 {offsets = [0, 10], sizes = [2, 5], strides = [1, 1]} : vector<2x15xf32> to vector<2x5xf32>
    %200 = vector.extract_strided_slice %191 {offsets = [0, 15], sizes = [2, 5], strides = [1, 1]} : vector<2x20xf32> to vector<2x5xf32>
    %201 = arith.mulf %198, %154 : vector<2x5xf32>
    %202 = arith.mulf %197, %200 : vector<2x5xf32>
    %203 = arith.addf %201, %202 : vector<2x5xf32>
    %204 = math.tanh %203 : vector<2x5xf32>
    %205 = arith.mulf %199, %204 : vector<2x5xf32>
    %c4_i32 = arith.constant 4 : i32
    %c2_i32_27 = arith.constant 2 : i32
    %206 = arith.muli %c4_i32, %c2_i32_27 : i32
    %207 = tpu.assume_multiple %206, 2 : i32
    %208 = arith.index_cast %207 : i32 to index
    %c0_28 = arith.constant 0 : index
    %209 = vector.load %arg7[%208, %c0_28] : memref<16x20xf32, #tpu.memory_space<vmem>>, vector<2x20xf32>
    %210 = vector.extract_strided_slice %205 {offsets = [0, 0], sizes = [2, 1], strides = [1, 1]} : vector<2x5xf32> to vector<2x1xf32>
    %211 = vector.extract_strided_slice %7 {offsets = [0, 0], sizes = [1, 20], strides = [1, 1]} : vector<5x20xf32> to vector<1x20xf32>
    %212 = vector.broadcast %210 : vector<2x1xf32> to vector<2x20xf32>
    %213 = vector.broadcast %211 : vector<1x20xf32> to vector<2x20xf32>
    %214 = arith.mulf %212, %213 : vector<2x20xf32>
    %215 = vector.extract_strided_slice %205 {offsets = [0, 1], sizes = [2, 1], strides = [1, 1]} : vector<2x5xf32> to vector<2x1xf32>
    %216 = vector.extract_strided_slice %7 {offsets = [1, 0], sizes = [1, 20], strides = [1, 1]} : vector<5x20xf32> to vector<1x20xf32>
    %217 = vector.broadcast %215 : vector<2x1xf32> to vector<2x20xf32>
    %218 = vector.broadcast %216 : vector<1x20xf32> to vector<2x20xf32>
    %219 = arith.mulf %217, %218 : vector<2x20xf32>
    %220 = vector.extract_strided_slice %205 {offsets = [0, 2], sizes = [2, 1], strides = [1, 1]} : vector<2x5xf32> to vector<2x1xf32>
    %221 = vector.extract_strided_slice %7 {offsets = [2, 0], sizes = [1, 20], strides = [1, 1]} : vector<5x20xf32> to vector<1x20xf32>
    %222 = vector.broadcast %220 : vector<2x1xf32> to vector<2x20xf32>
    %223 = vector.broadcast %221 : vector<1x20xf32> to vector<2x20xf32>
    %224 = arith.mulf %222, %223 : vector<2x20xf32>
    %225 = vector.extract_strided_slice %205 {offsets = [0, 3], sizes = [2, 1], strides = [1, 1]} : vector<2x5xf32> to vector<2x1xf32>
    %226 = vector.extract_strided_slice %7 {offsets = [3, 0], sizes = [1, 20], strides = [1, 1]} : vector<5x20xf32> to vector<1x20xf32>
    %227 = vector.broadcast %225 : vector<2x1xf32> to vector<2x20xf32>
    %228 = vector.broadcast %226 : vector<1x20xf32> to vector<2x20xf32>
    %229 = arith.mulf %227, %228 : vector<2x20xf32>
    %230 = vector.extract_strided_slice %205 {offsets = [0, 4], sizes = [2, 1], strides = [1, 1]} : vector<2x5xf32> to vector<2x1xf32>
    %231 = vector.extract_strided_slice %7 {offsets = [4, 0], sizes = [1, 20], strides = [1, 1]} : vector<5x20xf32> to vector<1x20xf32>
    %232 = vector.broadcast %230 : vector<2x1xf32> to vector<2x20xf32>
    %233 = vector.broadcast %231 : vector<1x20xf32> to vector<2x20xf32>
    %234 = arith.mulf %232, %233 : vector<2x20xf32>
    %235 = arith.addf %214, %219 : vector<2x20xf32>
    %236 = arith.addf %224, %229 : vector<2x20xf32>
    %237 = arith.addf %234, %209 : vector<2x20xf32>
    %238 = arith.addf %235, %236 : vector<2x20xf32>
    %239 = arith.addf %238, %237 : vector<2x20xf32>
    %240 = math.tanh %239 : vector<2x20xf32>
    %241 = vector.extract_strided_slice %240 {offsets = [0, 0], sizes = [2, 15], strides = [1, 1]} : vector<2x20xf32> to vector<2x15xf32>
    %cst_29 = arith.constant 5.000000e-01 : f32
    %242 = vector.broadcast %cst_29 : f32 to vector<2x15xf32>
    %243 = arith.mulf %242, %241 : vector<2x15xf32>
    %cst_30 = arith.constant 5.000000e-01 : f32
    %244 = vector.broadcast %cst_30 : f32 to vector<2x15xf32>
    %245 = arith.addf %243, %244 : vector<2x15xf32>
    %246 = vector.extract_strided_slice %245 {offsets = [0, 0], sizes = [2, 5], strides = [1, 1]} : vector<2x15xf32> to vector<2x5xf32>
    %247 = vector.extract_strided_slice %245 {offsets = [0, 5], sizes = [2, 5], strides = [1, 1]} : vector<2x15xf32> to vector<2x5xf32>
    %248 = vector.extract_strided_slice %245 {offsets = [0, 10], sizes = [2, 5], strides = [1, 1]} : vector<2x15xf32> to vector<2x5xf32>
    %249 = vector.extract_strided_slice %240 {offsets = [0, 15], sizes = [2, 5], strides = [1, 1]} : vector<2x20xf32> to vector<2x5xf32>
    %250 = arith.mulf %247, %203 : vector<2x5xf32>
    %251 = arith.mulf %246, %249 : vector<2x5xf32>
    %252 = arith.addf %250, %251 : vector<2x5xf32>
    %253 = math.tanh %252 : vector<2x5xf32>
    %254 = arith.mulf %248, %253 : vector<2x5xf32>
    %c5_i32 = arith.constant 5 : i32
    %c2_i32_31 = arith.constant 2 : i32
    %255 = arith.muli %c5_i32, %c2_i32_31 : i32
    %256 = tpu.assume_multiple %255, 2 : i32
    %257 = arith.index_cast %256 : i32 to index
    %c0_32 = arith.constant 0 : index
    %258 = vector.load %arg7[%257, %c0_32] : memref<16x20xf32, #tpu.memory_space<vmem>>, vector<2x20xf32>
    %259 = vector.extract_strided_slice %254 {offsets = [0, 0], sizes = [2, 1], strides = [1, 1]} : vector<2x5xf32> to vector<2x1xf32>
    %260 = vector.extract_strided_slice %7 {offsets = [0, 0], sizes = [1, 20], strides = [1, 1]} : vector<5x20xf32> to vector<1x20xf32>
    %261 = vector.broadcast %259 : vector<2x1xf32> to vector<2x20xf32>
    %262 = vector.broadcast %260 : vector<1x20xf32> to vector<2x20xf32>
    %263 = arith.mulf %261, %262 : vector<2x20xf32>
    %264 = vector.extract_strided_slice %254 {offsets = [0, 1], sizes = [2, 1], strides = [1, 1]} : vector<2x5xf32> to vector<2x1xf32>
    %265 = vector.extract_strided_slice %7 {offsets = [1, 0], sizes = [1, 20], strides = [1, 1]} : vector<5x20xf32> to vector<1x20xf32>
    %266 = vector.broadcast %264 : vector<2x1xf32> to vector<2x20xf32>
    %267 = vector.broadcast %265 : vector<1x20xf32> to vector<2x20xf32>
    %268 = arith.mulf %266, %267 : vector<2x20xf32>
    %269 = vector.extract_strided_slice %254 {offsets = [0, 2], sizes = [2, 1], strides = [1, 1]} : vector<2x5xf32> to vector<2x1xf32>
    %270 = vector.extract_strided_slice %7 {offsets = [2, 0], sizes = [1, 20], strides = [1, 1]} : vector<5x20xf32> to vector<1x20xf32>
    %271 = vector.broadcast %269 : vector<2x1xf32> to vector<2x20xf32>
    %272 = vector.broadcast %270 : vector<1x20xf32> to vector<2x20xf32>
    %273 = arith.mulf %271, %272 : vector<2x20xf32>
    %274 = vector.extract_strided_slice %254 {offsets = [0, 3], sizes = [2, 1], strides = [1, 1]} : vector<2x5xf32> to vector<2x1xf32>
    %275 = vector.extract_strided_slice %7 {offsets = [3, 0], sizes = [1, 20], strides = [1, 1]} : vector<5x20xf32> to vector<1x20xf32>
    %276 = vector.broadcast %274 : vector<2x1xf32> to vector<2x20xf32>
    %277 = vector.broadcast %275 : vector<1x20xf32> to vector<2x20xf32>
    %278 = arith.mulf %276, %277 : vector<2x20xf32>
    %279 = vector.extract_strided_slice %254 {offsets = [0, 4], sizes = [2, 1], strides = [1, 1]} : vector<2x5xf32> to vector<2x1xf32>
    %280 = vector.extract_strided_slice %7 {offsets = [4, 0], sizes = [1, 20], strides = [1, 1]} : vector<5x20xf32> to vector<1x20xf32>
    %281 = vector.broadcast %279 : vector<2x1xf32> to vector<2x20xf32>
    %282 = vector.broadcast %280 : vector<1x20xf32> to vector<2x20xf32>
    %283 = arith.mulf %281, %282 : vector<2x20xf32>
    %284 = arith.addf %263, %268 : vector<2x20xf32>
    %285 = arith.addf %273, %278 : vector<2x20xf32>
    %286 = arith.addf %283, %258 : vector<2x20xf32>
    %287 = arith.addf %284, %285 : vector<2x20xf32>
    %288 = arith.addf %287, %286 : vector<2x20xf32>
    %289 = math.tanh %288 : vector<2x20xf32>
    %290 = vector.extract_strided_slice %289 {offsets = [0, 0], sizes = [2, 15], strides = [1, 1]} : vector<2x20xf32> to vector<2x15xf32>
    %cst_33 = arith.constant 5.000000e-01 : f32
    %291 = vector.broadcast %cst_33 : f32 to vector<2x15xf32>
    %292 = arith.mulf %291, %290 : vector<2x15xf32>
    %cst_34 = arith.constant 5.000000e-01 : f32
    %293 = vector.broadcast %cst_34 : f32 to vector<2x15xf32>
    %294 = arith.addf %292, %293 : vector<2x15xf32>
    %295 = vector.extract_strided_slice %294 {offsets = [0, 0], sizes = [2, 5], strides = [1, 1]} : vector<2x15xf32> to vector<2x5xf32>
    %296 = vector.extract_strided_slice %294 {offsets = [0, 5], sizes = [2, 5], strides = [1, 1]} : vector<2x15xf32> to vector<2x5xf32>
    %297 = vector.extract_strided_slice %294 {offsets = [0, 10], sizes = [2, 5], strides = [1, 1]} : vector<2x15xf32> to vector<2x5xf32>
    %298 = vector.extract_strided_slice %289 {offsets = [0, 15], sizes = [2, 5], strides = [1, 1]} : vector<2x20xf32> to vector<2x5xf32>
    %299 = arith.mulf %296, %252 : vector<2x5xf32>
    %300 = arith.mulf %295, %298 : vector<2x5xf32>
    %301 = arith.addf %299, %300 : vector<2x5xf32>
    %302 = math.tanh %301 : vector<2x5xf32>
    %303 = arith.mulf %297, %302 : vector<2x5xf32>
    %c6_i32 = arith.constant 6 : i32
    %c2_i32_35 = arith.constant 2 : i32
    %304 = arith.muli %c6_i32, %c2_i32_35 : i32
    %305 = tpu.assume_multiple %304, 2 : i32
    %306 = arith.index_cast %305 : i32 to index
    %c0_36 = arith.constant 0 : index
    %307 = vector.load %arg7[%306, %c0_36] : memref<16x20xf32, #tpu.memory_space<vmem>>, vector<2x20xf32>
    %308 = vector.extract_strided_slice %303 {offsets = [0, 0], sizes = [2, 1], strides = [1, 1]} : vector<2x5xf32> to vector<2x1xf32>
    %309 = vector.extract_strided_slice %7 {offsets = [0, 0], sizes = [1, 20], strides = [1, 1]} : vector<5x20xf32> to vector<1x20xf32>
    %310 = vector.broadcast %308 : vector<2x1xf32> to vector<2x20xf32>
    %311 = vector.broadcast %309 : vector<1x20xf32> to vector<2x20xf32>
    %312 = arith.mulf %310, %311 : vector<2x20xf32>
    %313 = vector.extract_strided_slice %303 {offsets = [0, 1], sizes = [2, 1], strides = [1, 1]} : vector<2x5xf32> to vector<2x1xf32>
    %314 = vector.extract_strided_slice %7 {offsets = [1, 0], sizes = [1, 20], strides = [1, 1]} : vector<5x20xf32> to vector<1x20xf32>
    %315 = vector.broadcast %313 : vector<2x1xf32> to vector<2x20xf32>
    %316 = vector.broadcast %314 : vector<1x20xf32> to vector<2x20xf32>
    %317 = arith.mulf %315, %316 : vector<2x20xf32>
    %318 = vector.extract_strided_slice %303 {offsets = [0, 2], sizes = [2, 1], strides = [1, 1]} : vector<2x5xf32> to vector<2x1xf32>
    %319 = vector.extract_strided_slice %7 {offsets = [2, 0], sizes = [1, 20], strides = [1, 1]} : vector<5x20xf32> to vector<1x20xf32>
    %320 = vector.broadcast %318 : vector<2x1xf32> to vector<2x20xf32>
    %321 = vector.broadcast %319 : vector<1x20xf32> to vector<2x20xf32>
    %322 = arith.mulf %320, %321 : vector<2x20xf32>
    %323 = vector.extract_strided_slice %303 {offsets = [0, 3], sizes = [2, 1], strides = [1, 1]} : vector<2x5xf32> to vector<2x1xf32>
    %324 = vector.extract_strided_slice %7 {offsets = [3, 0], sizes = [1, 20], strides = [1, 1]} : vector<5x20xf32> to vector<1x20xf32>
    %325 = vector.broadcast %323 : vector<2x1xf32> to vector<2x20xf32>
    %326 = vector.broadcast %324 : vector<1x20xf32> to vector<2x20xf32>
    %327 = arith.mulf %325, %326 : vector<2x20xf32>
    %328 = vector.extract_strided_slice %303 {offsets = [0, 4], sizes = [2, 1], strides = [1, 1]} : vector<2x5xf32> to vector<2x1xf32>
    %329 = vector.extract_strided_slice %7 {offsets = [4, 0], sizes = [1, 20], strides = [1, 1]} : vector<5x20xf32> to vector<1x20xf32>
    %330 = vector.broadcast %328 : vector<2x1xf32> to vector<2x20xf32>
    %331 = vector.broadcast %329 : vector<1x20xf32> to vector<2x20xf32>
    %332 = arith.mulf %330, %331 : vector<2x20xf32>
    %333 = arith.addf %312, %317 : vector<2x20xf32>
    %334 = arith.addf %322, %327 : vector<2x20xf32>
    %335 = arith.addf %332, %307 : vector<2x20xf32>
    %336 = arith.addf %333, %334 : vector<2x20xf32>
    %337 = arith.addf %336, %335 : vector<2x20xf32>
    %338 = math.tanh %337 : vector<2x20xf32>
    %339 = vector.extract_strided_slice %338 {offsets = [0, 0], sizes = [2, 15], strides = [1, 1]} : vector<2x20xf32> to vector<2x15xf32>
    %cst_37 = arith.constant 5.000000e-01 : f32
    %340 = vector.broadcast %cst_37 : f32 to vector<2x15xf32>
    %341 = arith.mulf %340, %339 : vector<2x15xf32>
    %cst_38 = arith.constant 5.000000e-01 : f32
    %342 = vector.broadcast %cst_38 : f32 to vector<2x15xf32>
    %343 = arith.addf %341, %342 : vector<2x15xf32>
    %344 = vector.extract_strided_slice %343 {offsets = [0, 0], sizes = [2, 5], strides = [1, 1]} : vector<2x15xf32> to vector<2x5xf32>
    %345 = vector.extract_strided_slice %343 {offsets = [0, 5], sizes = [2, 5], strides = [1, 1]} : vector<2x15xf32> to vector<2x5xf32>
    %346 = vector.extract_strided_slice %343 {offsets = [0, 10], sizes = [2, 5], strides = [1, 1]} : vector<2x15xf32> to vector<2x5xf32>
    %347 = vector.extract_strided_slice %338 {offsets = [0, 15], sizes = [2, 5], strides = [1, 1]} : vector<2x20xf32> to vector<2x5xf32>
    %348 = arith.mulf %345, %301 : vector<2x5xf32>
    %349 = arith.mulf %344, %347 : vector<2x5xf32>
    %350 = arith.addf %348, %349 : vector<2x5xf32>
    %351 = math.tanh %350 : vector<2x5xf32>
    %352 = arith.mulf %346, %351 : vector<2x5xf32>
    %c7_i32 = arith.constant 7 : i32
    %c2_i32_39 = arith.constant 2 : i32
    %353 = arith.muli %c7_i32, %c2_i32_39 : i32
    %354 = tpu.assume_multiple %353, 2 : i32
    %355 = arith.index_cast %354 : i32 to index
    %c0_40 = arith.constant 0 : index
    %356 = vector.load %arg7[%355, %c0_40] : memref<16x20xf32, #tpu.memory_space<vmem>>, vector<2x20xf32>
    %357 = vector.extract_strided_slice %352 {offsets = [0, 0], sizes = [2, 1], strides = [1, 1]} : vector<2x5xf32> to vector<2x1xf32>
    %358 = vector.extract_strided_slice %7 {offsets = [0, 0], sizes = [1, 20], strides = [1, 1]} : vector<5x20xf32> to vector<1x20xf32>
    %359 = vector.broadcast %357 : vector<2x1xf32> to vector<2x20xf32>
    %360 = vector.broadcast %358 : vector<1x20xf32> to vector<2x20xf32>
    %361 = arith.mulf %359, %360 : vector<2x20xf32>
    %362 = vector.extract_strided_slice %352 {offsets = [0, 1], sizes = [2, 1], strides = [1, 1]} : vector<2x5xf32> to vector<2x1xf32>
    %363 = vector.extract_strided_slice %7 {offsets = [1, 0], sizes = [1, 20], strides = [1, 1]} : vector<5x20xf32> to vector<1x20xf32>
    %364 = vector.broadcast %362 : vector<2x1xf32> to vector<2x20xf32>
    %365 = vector.broadcast %363 : vector<1x20xf32> to vector<2x20xf32>
    %366 = arith.mulf %364, %365 : vector<2x20xf32>
    %367 = vector.extract_strided_slice %352 {offsets = [0, 2], sizes = [2, 1], strides = [1, 1]} : vector<2x5xf32> to vector<2x1xf32>
    %368 = vector.extract_strided_slice %7 {offsets = [2, 0], sizes = [1, 20], strides = [1, 1]} : vector<5x20xf32> to vector<1x20xf32>
    %369 = vector.broadcast %367 : vector<2x1xf32> to vector<2x20xf32>
    %370 = vector.broadcast %368 : vector<1x20xf32> to vector<2x20xf32>
    %371 = arith.mulf %369, %370 : vector<2x20xf32>
    %372 = vector.extract_strided_slice %352 {offsets = [0, 3], sizes = [2, 1], strides = [1, 1]} : vector<2x5xf32> to vector<2x1xf32>
    %373 = vector.extract_strided_slice %7 {offsets = [3, 0], sizes = [1, 20], strides = [1, 1]} : vector<5x20xf32> to vector<1x20xf32>
    %374 = vector.broadcast %372 : vector<2x1xf32> to vector<2x20xf32>
    %375 = vector.broadcast %373 : vector<1x20xf32> to vector<2x20xf32>
    %376 = arith.mulf %374, %375 : vector<2x20xf32>
    %377 = vector.extract_strided_slice %352 {offsets = [0, 4], sizes = [2, 1], strides = [1, 1]} : vector<2x5xf32> to vector<2x1xf32>
    %378 = vector.extract_strided_slice %7 {offsets = [4, 0], sizes = [1, 20], strides = [1, 1]} : vector<5x20xf32> to vector<1x20xf32>
    %379 = vector.broadcast %377 : vector<2x1xf32> to vector<2x20xf32>
    %380 = vector.broadcast %378 : vector<1x20xf32> to vector<2x20xf32>
    %381 = arith.mulf %379, %380 : vector<2x20xf32>
    %382 = arith.addf %361, %366 : vector<2x20xf32>
    %383 = arith.addf %371, %376 : vector<2x20xf32>
    %384 = arith.addf %381, %356 : vector<2x20xf32>
    %385 = arith.addf %382, %383 : vector<2x20xf32>
    %386 = arith.addf %385, %384 : vector<2x20xf32>
    %387 = math.tanh %386 : vector<2x20xf32>
    %388 = vector.extract_strided_slice %387 {offsets = [0, 0], sizes = [2, 15], strides = [1, 1]} : vector<2x20xf32> to vector<2x15xf32>
    %cst_41 = arith.constant 5.000000e-01 : f32
    %389 = vector.broadcast %cst_41 : f32 to vector<2x15xf32>
    %390 = arith.mulf %389, %388 : vector<2x15xf32>
    %cst_42 = arith.constant 5.000000e-01 : f32
    %391 = vector.broadcast %cst_42 : f32 to vector<2x15xf32>
    %392 = arith.addf %390, %391 : vector<2x15xf32>
    %393 = vector.extract_strided_slice %392 {offsets = [0, 0], sizes = [2, 5], strides = [1, 1]} : vector<2x15xf32> to vector<2x5xf32>
    %394 = vector.extract_strided_slice %392 {offsets = [0, 5], sizes = [2, 5], strides = [1, 1]} : vector<2x15xf32> to vector<2x5xf32>
    %395 = vector.extract_strided_slice %392 {offsets = [0, 10], sizes = [2, 5], strides = [1, 1]} : vector<2x15xf32> to vector<2x5xf32>
    %396 = vector.extract_strided_slice %387 {offsets = [0, 15], sizes = [2, 5], strides = [1, 1]} : vector<2x20xf32> to vector<2x5xf32>
    %397 = arith.mulf %394, %350 : vector<2x5xf32>
    %398 = arith.mulf %393, %396 : vector<2x5xf32>
    %399 = arith.addf %397, %398 : vector<2x5xf32>
    %400 = math.tanh %399 : vector<2x5xf32>
    %401 = arith.mulf %395, %400 : vector<2x5xf32>
    %c8_i32 = arith.constant 8 : i32
    %c0_43 = arith.constant 0 : index
    %c0_44 = arith.constant 0 : index
    %402 = vector.load %arg4[%c0_43, %c0_44] : memref<5x3xf32, #tpu.memory_space<vmem>>, vector<5x3xf32>
    %403 = vector.extract_strided_slice %401 {offsets = [0, 0], sizes = [2, 1], strides = [1, 1]} : vector<2x5xf32> to vector<2x1xf32>
    %404 = vector.extract_strided_slice %402 {offsets = [0, 0], sizes = [1, 3], strides = [1, 1]} : vector<5x3xf32> to vector<1x3xf32>
    %405 = vector.broadcast %403 : vector<2x1xf32> to vector<2x3xf32>
    %406 = vector.broadcast %404 : vector<1x3xf32> to vector<2x3xf32>
    %407 = arith.mulf %405, %406 : vector<2x3xf32>
    %408 = vector.extract_strided_slice %401 {offsets = [0, 1], sizes = [2, 1], strides = [1, 1]} : vector<2x5xf32> to vector<2x1xf32>
    %409 = vector.extract_strided_slice %402 {offsets = [1, 0], sizes = [1, 3], strides = [1, 1]} : vector<5x3xf32> to vector<1x3xf32>
    %410 = vector.broadcast %408 : vector<2x1xf32> to vector<2x3xf32>
    %411 = vector.broadcast %409 : vector<1x3xf32> to vector<2x3xf32>
    %412 = arith.mulf %410, %411 : vector<2x3xf32>
    %413 = vector.extract_strided_slice %401 {offsets = [0, 2], sizes = [2, 1], strides = [1, 1]} : vector<2x5xf32> to vector<2x1xf32>
    %414 = vector.extract_strided_slice %402 {offsets = [2, 0], sizes = [1, 3], strides = [1, 1]} : vector<5x3xf32> to vector<1x3xf32>
    %415 = vector.broadcast %413 : vector<2x1xf32> to vector<2x3xf32>
    %416 = vector.broadcast %414 : vector<1x3xf32> to vector<2x3xf32>
    %417 = arith.mulf %415, %416 : vector<2x3xf32>
    %418 = vector.extract_strided_slice %401 {offsets = [0, 3], sizes = [2, 1], strides = [1, 1]} : vector<2x5xf32> to vector<2x1xf32>
    %419 = vector.extract_strided_slice %402 {offsets = [3, 0], sizes = [1, 3], strides = [1, 1]} : vector<5x3xf32> to vector<1x3xf32>
    %420 = vector.broadcast %418 : vector<2x1xf32> to vector<2x3xf32>
    %421 = vector.broadcast %419 : vector<1x3xf32> to vector<2x3xf32>
    %422 = arith.mulf %420, %421 : vector<2x3xf32>
    %423 = vector.extract_strided_slice %401 {offsets = [0, 4], sizes = [2, 1], strides = [1, 1]} : vector<2x5xf32> to vector<2x1xf32>
    %424 = vector.extract_strided_slice %402 {offsets = [4, 0], sizes = [1, 3], strides = [1, 1]} : vector<5x3xf32> to vector<1x3xf32>
    %425 = vector.broadcast %423 : vector<2x1xf32> to vector<2x3xf32>
    %426 = vector.broadcast %424 : vector<1x3xf32> to vector<2x3xf32>
    %427 = arith.mulf %425, %426 : vector<2x3xf32>
    %c0_45 = arith.constant 0 : index
    %c0_46 = arith.constant 0 : index
    %428 = vector.load %arg5[%c0_45, %c0_46] : memref<1x3xf32, #tpu.memory_space<vmem>>, vector<1x3xf32>
    %429 = arith.addf %407, %412 : vector<2x3xf32>
    %430 = arith.addf %417, %422 : vector<2x3xf32>
    %431 = vector.broadcast %428 : vector<1x3xf32> to vector<2x3xf32>
    %432 = arith.addf %427, %431 : vector<2x3xf32>
    %433 = arith.addf %429, %430 : vector<2x3xf32>
    %434 = arith.addf %433, %432 : vector<2x3xf32>
    %c0_47 = arith.constant 0 : index
    %c0_48 = arith.constant 0 : index
    %435 = vector.load %arg6[%c0_47, %c0_48] : memref<2x3xf32, #tpu.memory_space<vmem>>, vector<2x3xf32>
    tpu.vector_store %arg6[%c0_47, %c0_48], %434 {strides = array<i32>} : memref<2x3xf32, #tpu.memory_space<vmem>>, vector<2x3xf32>,
    return
  }
}

</mosaic_0001>

<bundles_post_ra>
// kernel: tpu_custom_call.1
= control target key start
LH: loop header
LB: loop body
LE: loop exit
PB: predicated region body
PF: predicated region fallthrough
CT: control target
= control target key end

     0   :  { %11 = vsyncpa [#allocation4], 0  ;;  %s918_s0 = inlined_call_operand.hbm [shape: f32[16,20], index: 0, kind: input, shape index: {}]   ;;  %s919_s1 = inlined_call_operand.hbm [shape: f32[20,20], index: 1, kind: input, shape index: {}]   ;;  %s920_s2 = inlined_call_operand.vmem [shape: f32[5,20], index: 2, kind: input, shape index: {}]   ;;  %s921_s3 = inlined_call_operand.vmem [shape: f32[1,20], index: 3, kind: input, shape index: {}]   ;;  %s922_s4 = inlined_call_operand.vmem [shape: f32[5,3], index: 4, kind: input, shape index: {}]   ;;  %s923_s5 = inlined_call_operand.vmem [shape: f32[1,3], index: 5, kind: input, shape index: {}]   ;;  %s924_s6 = inlined_call_operand.hbm [shape: f32[2,3], index: 6, kind: output, shape index: {}]  }
   0x1   :  { %12 = vsyncpa [#allocation7], 0 }
   0x2   :  { %13 = vsyncpa [#allocation5], 0  ;;  %s18_s23 = sshll.u32 %s918_s0, 4  ;;  %s734_s24 = smov [#allocation3]   ;;  %s19_s23 = int_to_ptr.hbm [resolvable:$true] %s18_s23 }
   0x3   :  { %s20_s25 = sshll.u32 %s734_s24, 4  ;;  %s31_s28 = sshll.u32 %s919_s1, 4  ;;  %s21_s25 = int_to_ptr.vmem [resolvable:$true] %s20_s25  ;;  %s32_s28 = int_to_ptr.hbm [resolvable:$true] %s31_s28 }
   0x4   :  { %s735_s29 = smov 128   ;;  %s736_s30 = smov 8  }
   0x5   :  { %26 = dma.hbm_to_vmem [thread:$0]  %s19_s23, 256, %s21_s25, [#allocation4], %s735_s29, %s735_s29, %s736_s30  }
   0x6   :  { %s737_s7 = smov [#allocation6]  }
   0x7   :  { %s33_s8 = sshll.u32 %s737_s7, 4  ;;  %s34_s8 = int_to_ptr.vmem [resolvable:$true] %s33_s8 }
   0x8   :  { %39 = dma.hbm_to_vmem [thread:$0]  %s32_s28, 384, %s34_s8, [#allocation7], %s735_s29, %s735_s29, %s736_s30  }
   0x9   :  { %728 = dma.done.wait [#allocation4], 256  }
   0xa   :  { %729 = vsyncadd [#allocation4], 4294967040 }
   0xb   :  { %730 = dma.done.wait [#allocation7], 384  }
   0xc   :  { %731 = vsyncadd [#allocation7], 4294966912  ;;  %vm72_vm0 = vcmask 1043456   ;;  %v60_v0 = vld [vmem:[#allocation6 + $0x10] sm:$0xf]  ;;  %v59_v1 = vld [vmem:[#allocation6 + $0x8] sm:$0xff] }
   0xd   :  { %570 = vmatpush.msk.msra.mxu0 %vm72_vm0, %v60_v0  ;;  %573 = vmatpush.msk.msra.mxu1 %vm72_vm0, %v60_v0  ;;  %v58_v2 = vld [vmem:[#allocation6] sm:$0xff]  ;;  %v56_v3 = vld [vmem:[#allocation3] sm:$0xff]  ;;  %vm65_vm1 = vcmask 162816   ;;  %v740_v33 = vmov 13   ;;  %v741_v34 = vmov 11   ;;  %v742_v35 = vmov 10  }
   0xe   :  { %v101_v4 = vld [vmem:[%s920_s2] sm:$0x1f]  ;;  %s738_s2 = smov 113   ;;  %591 = vset.pattern.permute.xlu0 %v740_v33  ;;  %589 = vset.pattern.permute.xlu2 %v741_v34  ;;  %v743_v38 = vmov 12   ;;  %v744_v39 = vmov 14   ;;  %s559_s18 = sshll.u32 %s924_s6, 4  ;;  %s560_s18 = int_to_ptr.hbm [resolvable:$true] %s559_s18 }
   0xf   :  { %90 = vmatpush.msra.mxu0 %v59_v1  ;;  %574 = vmatpush.msra.mxu1 %v59_v1  ;;  %v791_v5 = vperm.slane %v101_v4, 0  ;;  %v796_v6 = vld [vmem:[%s921_s3] ss:$0 sm:$0xff]  ;;  %v798_v7 = vperm.slane %v101_v4, 1  ;;  %v800_v8 = vperm.slane %v101_v4, 2  ;;  %v802_v9 = vperm.slane %v101_v4, 3 }
  0x10   :  { %v810_v16 = vperm.slane %v101_v4, 4  ;;  %s739_s3 = smov 5   ;;  %588 = vset.pattern.permute.xlu1 %v742_v35  ;;  %vm550_vm2 = vcmask 17408  }
  0x11   :  { %91 = vmatpush.msra.mxu0 %v58_v2  ;;  %575 = vmatpush.msra.mxu1 %v58_v2  ;;  %v104_v11 = vmul.f32 0.0, %v791_v5  ;;  %v106_v13 = vmul.f32 0.0, %v798_v7  ;;  %v108_v14 = vmul.f32 0.0, %v800_v8  ;;  %v110_v15 = vmul.f32 0.0, %v802_v9 }
  0x12   :  { %571 = vmatmul.msk.f32.vlgmr.msra.gmra.mxu0 %vm65_vm1, %v56_v3  ;;  %v112_v19 = vmul.f32 0.0, %v810_v16 }
  0x13   :  { %v113_v17 = vadd.f32 %v106_v13, %v104_v11  ;;  %v114_v18 = vadd.f32 %v110_v15, %v108_v14 }
  0x15   :  { %v116_v20 = vadd.f32 %v114_v18, %v113_v17 }
  0x8f   :  { %v93_v10 = vpop.f32.mrf.mxu0 }
  0x90   :  { %v94_v12 = vadd.f32 %v796_v6, %v93_v10 }
  0x92   :  { %99 = vst.msk [vmem:[#allocation2] sm:$0xff] %vm65_vm1, %v94_v12 }
  0x99   :  { %v102_v21 = vld [vmem:[#allocation2] sm:$0x3]  ;;  %v139_v52 = vld [vmem:[#allocation2 + $0x2] sm:$0x3] }
  0x9a   :  { %v115_v22 = vadd.f32 %v112_v19, %v102_v21  ;;  %v192_v21 = vld [vmem:[#allocation2 + $0x4] sm:$0x3] }
  0x9c   :  { %v117_v23 = vadd.f32 %v116_v20, %v115_v22 }
  0x9e   :  { %624 = vtanh.f32 %v117_v23 }
  0xa4   :  { %v625_v24 = vpop.eup %624 }
  0xa5   :  { %123 = vrot.lane.b32.xlu0 %v625_v24, %s738_s2  ;;  %v119_v25 = vmul.f32 0.5, %v625_v24 }
  0xa7   :  { %v120_v26 = vadd.f32 0.5, %v119_v25 }
  0xa9   :  { %v121_v29 = vmul.f32 0.0, %v120_v26 }
 0x117   :  { %v124_v27 = vpop.permute.xlu0 %123 }
 0x118   :  { %v126_v28 = vmul.f32 %v124_v27, %v120_v26 }
 0x11a   :  { %128 = vrot.lane.b32.xlu0 %v126_v28, %s739_s3 }
 0x18c   :  { %v129_v30 = vpop.permute.xlu0 %128 }
 0x18d   :  { %v131_v31 = vadd.f32 %v129_v30, %v121_v29 }
 0x18f   :  { %626 = vtanh.f32 %v131_v31 }
 0x195   :  { %v627_v32 = vpop.eup %626 }
 0x196   :  { %134 = vrot.lane.b32.xlu1 %v627_v32, %s739_s3 }
 0x208   :  { %v135_v36 = vpop.permute.xlu1 %134 }
 0x209   :  { %v137_v37 = vmul.f32 %v135_v36, %v120_v26 }
 0x20b   :  { %157 = vperm.xlu0 %591, %v137_v37   ;;  %147 = vperm.xlu2 %589, %v137_v37  }
 0x20c   :  { %142 = vperm.xlu1 %588, %v137_v37  }
 0x213   :  { %590 = vset.pattern.permute.xlu2 %v743_v38  ;;  %593 = vset.pattern.permute.xlu0 %v742_v35 }
 0x214   :  { %592 = vset.pattern.permute.xlu1 %v744_v39  ;;  %152 = vperm.xlu2 %590, %v137_v37  }
 0x215   :  { %162 = vperm.xlu1 %592, %v137_v37  }
 0x21d   :  { %594 = vset.pattern.permute.xlu1 %v741_v34 }
 0x265   :  { %v148_v40 = vpop.permute.xlu2 %147 }
 0x266   :  { %v150_v46 = vmul.f32 %v148_v40, %v798_v7 }
 0x26e   :  { %v153_v43 = vpop.permute.xlu2 %152 }
 0x26f   :  { %v155_v47 = vmul.f32 %v153_v43, %v800_v8 }
 0x27d   :  { %v158_v42 = vpop.permute.xlu0 %157 }
 0x27e   :  { %v143_v41 = vpop.permute.xlu1 %142  ;;  %v160_v44 = vmul.f32 %v158_v42, %v802_v9 }
 0x27f   :  { %v145_v45 = vmul.f32 %v143_v41, %v791_v5 }
 0x280   :  { %v167_v48 = vadd.f32 %v160_v44, %v155_v47 }
 0x281   :  { %v166_v49 = vadd.f32 %v150_v46, %v145_v45 }
 0x283   :  { %v169_v53 = vadd.f32 %v167_v48, %v166_v49 }
 0x287   :  { %v163_v50 = vpop.permute.xlu1 %162 }
 0x288   :  { %v165_v51 = vmul.f32 %v163_v50, %v810_v16 }
 0x28a   :  { %v168_v54 = vadd.f32 %v165_v51, %v139_v52 }
 0x28c   :  { %v170_v55 = vadd.f32 %v169_v53, %v168_v54  ;;  %v245_v53 = vld [vmem:[#allocation2 + $0x6] sm:$0x3] }
 0x28e   :  { %628 = vtanh.f32 %v170_v55 }
 0x294   :  { %v629_v56 = vpop.eup %628 }
 0x295   :  { %176 = vrot.lane.b32.xlu2 %v629_v56, %s738_s2  ;;  %v172_v57 = vmul.f32 0.5, %v629_v56 }
 0x297   :  { %v173_v58 = vadd.f32 0.5, %v172_v57 }
 0x299   :  { %v174_v61 = vmul.f32 %v173_v58, %v131_v31 }
 0x2ef   :  { %v177_v59 = vpop.permute.xlu2 %176 }
 0x2f0   :  { %v179_v60 = vmul.f32 %v177_v59, %v173_v58 }
 0x2f2   :  { %181 = vrot.lane.b32.xlu1 %v179_v60, %s739_s3 }
 0x364   :  { %v182_v62 = vpop.permute.xlu1 %181 }
 0x365   :  { %v184_v63 = vadd.f32 %v182_v62, %v174_v61  ;;  %v57_v62 = vld [vmem:[#allocation3 + $0x8] sm:$0xff] }
 0x366   :  { %572 = vmatmul.msk.f32.vlgmr.msra.gmra.mxu1 %vm65_vm1, %v57_v62 }
 0x367   :  { %630 = vtanh.f32 %v184_v63 }
 0x36d   :  { %v631_v0 = vpop.eup %630 }
 0x36e   :  { %187 = vrot.lane.b32.xlu2 %v631_v0, %s739_s3 }
 0x3c8   :  { %v188_v1 = vpop.permute.xlu2 %187 }
 0x3c9   :  { %v190_v2 = vmul.f32 %v188_v1, %v173_v58 }
 0x3cb   :  { %205 = vperm.xlu2 %590, %v190_v2   ;;  %200 = vperm.xlu1 %594, %v190_v2  }
 0x3cc   :  { %195 = vperm.xlu0 %593, %v190_v2  }
 0x3d3   :  { %596 = vset.pattern.permute.xlu2 %v744_v39  ;;  %595 = vset.pattern.permute.xlu1 %v740_v33 }
 0x3d4   :  { %215 = vperm.xlu2 %596, %v190_v2   ;;  %210 = vperm.xlu1 %595, %v190_v2  }
 0x3dc   :  { %598 = vset.pattern.permute.xlu2 %v743_v38  ;;  %597 = vset.pattern.permute.xlu1 %v741_v34 }
 0x425   :  { %v206_v3 = vpop.permute.xlu2 %205 }
 0x426   :  { %v208_v15 = vmul.f32 %v206_v3, %v800_v8 }
 0x42e   :  { %v216_v11 = vpop.permute.xlu2 %215 }
 0x42f   :  { %v218_v17 = vmul.f32 %v216_v11, %v810_v16 }
 0x431   :  { %v221_v22 = vadd.f32 %v218_v17, %v192_v21 }
 0x43d   :  { %v201_v4 = vpop.permute.xlu1 %200 }
 0x43e   :  { %v196_v10 = vpop.permute.xlu0 %195  ;;  %v203_v12 = vmul.f32 %v201_v4, %v798_v7 }
 0x43f   :  { %v198_v13 = vmul.f32 %v196_v10, %v791_v5  ;;  %v96_v10 = vpop.f32.mrf.mxu1 }
 0x440   :  { %v97_v11 = vadd.f32 %v796_v6, %v96_v10 }
 0x441   :  { %v219_v19 = vadd.f32 %v203_v12, %v198_v13 }
 0x442   :  { %100 = vst.msk [vmem:[#allocation2 + $0x8] sm:$0xff] %vm65_vm1, %v97_v11 }
 0x446   :  { %v211_v14 = vpop.permute.xlu1 %210 }
 0x447   :  { %v213_v18 = vmul.f32 %v211_v14, %v802_v9 }
 0x449   :  { %v220_v20 = vadd.f32 %v213_v18, %v208_v15 }
 0x44b   :  { %v222_v23 = vadd.f32 %v220_v20, %v219_v19 }
 0x44d   :  { %v223_v24 = vadd.f32 %v222_v23, %v221_v22  ;;  %v298_v23 = vld [vmem:[#allocation2 + $0x8] sm:$0x3] }
 0x44f   :  { %632 = vtanh.f32 %v223_v24 }
 0x455   :  { %v633_v25 = vpop.eup %632 }
 0x456   :  { %229 = vrot.lane.b32.xlu0 %v633_v25, %s738_s2  ;;  %v225_v26 = vmul.f32 0.5, %v633_v25 }
 0x458   :  { %v226_v27 = vadd.f32 0.5, %v225_v26 }
 0x45a   :  { %v227_v30 = vmul.f32 %v226_v27, %v184_v63 }
 0x4c8   :  { %v230_v28 = vpop.permute.xlu0 %229 }
 0x4c9   :  { %v232_v29 = vmul.f32 %v230_v28, %v226_v27 }
 0x4cb   :  { %234 = vrot.lane.b32.xlu1 %v232_v29, %s739_s3 }
 0x53d   :  { %v235_v31 = vpop.permute.xlu1 %234 }
 0x53e   :  { %v237_v32 = vadd.f32 %v235_v31, %v227_v30 }
 0x540   :  { %634 = vtanh.f32 %v237_v32 }
 0x546   :  { %v635_v36 = vpop.eup %634 }
 0x547   :  { %240 = vrot.lane.b32.xlu2 %v635_v36, %s739_s3 }
 0x5a1   :  { %v241_v37 = vpop.permute.xlu2 %240 }
 0x5a2   :  { %v243_v40 = vmul.f32 %v241_v37, %v226_v27 }
 0x5a4   :  { %258 = vperm.xlu2 %598, %v243_v40   ;;  %253 = vperm.xlu1 %597, %v243_v40  }
 0x5a5   :  { %248 = vperm.xlu0 %593, %v243_v40  }
 0x5ac   :  { %600 = vset.pattern.permute.xlu1 %v744_v39 }
 0x5ad   :  { %599 = vset.pattern.permute.xlu0 %v740_v33  ;;  %268 = vperm.xlu1 %600, %v243_v40  }
 0x5ae   :  { %263 = vperm.xlu0 %599, %v243_v40  }
 0x5b5   :  { %602 = vset.pattern.permute.xlu1 %v741_v34 }
 0x5b6   :  { %601 = vset.pattern.permute.xlu0 %v742_v35 }
 0x5fe   :  { %v259_v43 = vpop.permute.xlu2 %258 }
 0x5ff   :  { %v261_v48 = vmul.f32 %v259_v43, %v800_v8 }
 0x616   :  { %v254_v41 = vpop.permute.xlu1 %253 }
 0x617   :  { %v249_v42 = vpop.permute.xlu0 %248  ;;  %v256_v44 = vmul.f32 %v254_v41, %v798_v7 }
 0x618   :  { %v251_v45 = vmul.f32 %v249_v42, %v791_v5 }
 0x61a   :  { %v272_v51 = vadd.f32 %v256_v44, %v251_v45 }
 0x61f   :  { %v269_v46 = vpop.permute.xlu1 %268 }
 0x620   :  { %v264_v47 = vpop.permute.xlu0 %263  ;;  %v271_v49 = vmul.f32 %v269_v46, %v810_v16 }
 0x621   :  { %v266_v50 = vmul.f32 %v264_v47, %v802_v9 }
 0x622   :  { %v274_v54 = vadd.f32 %v271_v49, %v245_v53 }
 0x623   :  { %v273_v52 = vadd.f32 %v266_v50, %v261_v48 }
 0x625   :  { %v275_v55 = vadd.f32 %v273_v52, %v272_v51 }
 0x627   :  { %v276_v56 = vadd.f32 %v275_v55, %v274_v54 }
 0x629   :  { %636 = vtanh.f32 %v276_v56  ;;  %v351_v56 = vld [vmem:[#allocation2 + $0xa] sm:$0x3] }
 0x62f   :  { %v637_v57 = vpop.eup %636 }
 0x630   :  { %282 = vrot.lane.b32.xlu2 %v637_v57, %s738_s2  ;;  %v278_v58 = vmul.f32 0.5, %v637_v57 }
 0x632   :  { %v279_v59 = vadd.f32 0.5, %v278_v58 }
 0x634   :  { %v280_v63 = vmul.f32 %v279_v59, %v237_v32 }
 0x68a   :  { %v283_v60 = vpop.permute.xlu2 %282 }
 0x68b   :  { %v285_v61 = vmul.f32 %v283_v60, %v279_v59 }
 0x68d   :  { %287 = vrot.lane.b32.xlu1 %v285_v61, %s739_s3 }
 0x6ff   :  { %v288_v0 = vpop.permute.xlu1 %287 }
 0x700   :  { %v290_v1 = vadd.f32 %v288_v0, %v280_v63 }
 0x702   :  { %638 = vtanh.f32 %v290_v1 }
 0x708   :  { %v639_v2 = vpop.eup %638 }
 0x709   :  { %293 = vrot.lane.b32.xlu2 %v639_v2, %s739_s3 }
 0x763   :  { %v294_v3 = vpop.permute.xlu2 %293 }
 0x764   :  { %v296_v4 = vmul.f32 %v294_v3, %v279_v59 }
 0x766   :  { %311 = vperm.xlu2 %598, %v296_v4   ;;  %306 = vperm.xlu1 %602, %v296_v4  }
 0x767   :  { %301 = vperm.xlu0 %601, %v296_v4  }
 0x76e   :  { %604 = vset.pattern.permute.xlu2 %v744_v39  ;;  %603 = vset.pattern.permute.xlu1 %v740_v33 }
 0x76f   :  { %321 = vperm.xlu2 %604, %v296_v4   ;;  %316 = vperm.xlu1 %603, %v296_v4  }
 0x777   :  { %606 = vset.pattern.permute.xlu2 %v743_v38  ;;  %605 = vset.pattern.permute.xlu1 %v741_v34 }
 0x7c0   :  { %v312_v12 = vpop.permute.xlu2 %311 }
 0x7c1   :  { %v314_v20 = vmul.f32 %v312_v12, %v800_v8 }
 0x7c9   :  { %v322_v15 = vpop.permute.xlu2 %321 }
 0x7ca   :  { %v324_v21 = vmul.f32 %v322_v15, %v810_v16 }
 0x7cc   :  { %v327_v25 = vadd.f32 %v324_v21, %v298_v23 }
 0x7d8   :  { %v307_v13 = vpop.permute.xlu1 %306 }
 0x7d9   :  { %v302_v14 = vpop.permute.xlu0 %301  ;;  %v309_v17 = vmul.f32 %v307_v13, %v798_v7 }
 0x7da   :  { %v304_v18 = vmul.f32 %v302_v14, %v791_v5 }
 0x7dc   :  { %v325_v24 = vadd.f32 %v309_v17, %v304_v18 }
 0x7e1   :  { %v317_v19 = vpop.permute.xlu1 %316 }
 0x7e2   :  { %v319_v22 = vmul.f32 %v317_v19, %v802_v9 }
 0x7e4   :  { %v326_v6 = vadd.f32 %v319_v22, %v314_v20 }
 0x7e6   :  { %v328_v26 = vadd.f32 %v326_v6, %v325_v24 }
 0x7e8   :  { %v329_v27 = vadd.f32 %v328_v26, %v327_v25 }
 0x7ea   :  { %640 = vtanh.f32 %v329_v27 }
 0x7f0   :  { %v641_v28 = vpop.eup %640 }
 0x7f1   :  { %335 = vrot.lane.b32.xlu0 %v641_v28, %s738_s2  ;;  %v331_v29 = vmul.f32 0.5, %v641_v28 }
 0x7f3   :  { %v332_v30 = vadd.f32 0.5, %v331_v29 }
 0x7f5   :  { %v333_v36 = vmul.f32 %v332_v30, %v290_v1 }
 0x863   :  { %v336_v31 = vpop.permute.xlu0 %335 }
 0x864   :  { %v338_v32 = vmul.f32 %v336_v31, %v332_v30 }
 0x866   :  { %340 = vrot.lane.b32.xlu1 %v338_v32, %s739_s3 }
 0x8d8   :  { %v341_v37 = vpop.permute.xlu1 %340 }
 0x8d9   :  { %v343_v40 = vadd.f32 %v341_v37, %v333_v36 }
 0x8db   :  { %642 = vtanh.f32 %v343_v40 }
 0x8e1   :  { %v643_v41 = vpop.eup %642 }
 0x8e2   :  { %346 = vrot.lane.b32.xlu2 %v643_v41, %s739_s3 }
 0x93c   :  { %v347_v42 = vpop.permute.xlu2 %346 }
 0x93d   :  { %v349_v43 = vmul.f32 %v347_v42, %v332_v30 }
 0x93f   :  { %364 = vperm.xlu2 %606, %v349_v43   ;;  %359 = vperm.xlu1 %605, %v349_v43  }
 0x940   :  { %354 = vperm.xlu0 %601, %v349_v43  }
 0x947   :  { %608 = vset.pattern.permute.xlu1 %v744_v39 }
 0x948   :  { %607 = vset.pattern.permute.xlu0 %v740_v33  ;;  %374 = vperm.xlu1 %608, %v349_v43  }
 0x949   :  { %369 = vperm.xlu0 %607, %v349_v43  }
 0x950   :  { %610 = vset.pattern.permute.xlu1 %v741_v34 }
 0x951   :  { %609 = vset.pattern.permute.xlu0 %v742_v35 }
 0x999   :  { %v365_v46 = vpop.permute.xlu2 %364 }
 0x99a   :  { %v367_v51 = vmul.f32 %v365_v46, %v800_v8 }
 0x9b1   :  { %v360_v44 = vpop.permute.xlu1 %359 }
 0x9b2   :  { %v355_v45 = vpop.permute.xlu0 %354  ;;  %v362_v47 = vmul.f32 %v360_v44, %v798_v7 }
 0x9b3   :  { %v357_v48 = vmul.f32 %v355_v45, %v791_v5 }
 0x9b5   :  { %v378_v54 = vadd.f32 %v362_v47, %v357_v48 }
 0x9ba   :  { %v375_v49 = vpop.permute.xlu1 %374 }
 0x9bb   :  { %v370_v50 = vpop.permute.xlu0 %369  ;;  %v377_v52 = vmul.f32 %v375_v49, %v810_v16 }
 0x9bc   :  { %v372_v53 = vmul.f32 %v370_v50, %v802_v9 }
 0x9bd   :  { %v380_v57 = vadd.f32 %v377_v52, %v351_v56 }
 0x9be   :  { %v379_v55 = vadd.f32 %v372_v53, %v367_v51 }
 0x9c0   :  { %v381_v58 = vadd.f32 %v379_v55, %v378_v54 }
 0x9c2   :  { %v382_v59 = vadd.f32 %v381_v58, %v380_v57 }
 0x9c4   :  { %644 = vtanh.f32 %v382_v59 }
 0x9ca   :  { %v645_v60 = vpop.eup %644 }
 0x9cb   :  { %388 = vrot.lane.b32.xlu2 %v645_v60, %s738_s2  ;;  %v384_v61 = vmul.f32 0.5, %v645_v60 }
 0x9cd   :  { %v385_v62 = vadd.f32 0.5, %v384_v61 }
 0x9cf   :  { %v386_v1 = vmul.f32 %v385_v62, %v343_v40 }
 0xa25   :  { %v389_v63 = vpop.permute.xlu2 %388 }
 0xa26   :  { %v391_v0 = vmul.f32 %v389_v63, %v385_v62 }
 0xa28   :  { %393 = vrot.lane.b32.xlu1 %v391_v0, %s739_s3 }
 0xa9a   :  { %v394_v2 = vpop.permute.xlu1 %393 }
 0xa9b   :  { %v396_v3 = vadd.f32 %v394_v2, %v386_v1  ;;  %v509_v1 = vld [vmem:[%s922_s4] sm:$0x1f]  ;;  %s745_s4 = smov [#allocation8]  }
 0xa9c   :  { %v521_v2 = vperm.slane %v509_v1, 1  ;;  %s557_s15 = sshll.u32 %s745_s4, 4  ;;  %s558_s15 = int_to_ptr.vmem [resolvable:$true] %s557_s15 }
 0xa9d   :  { %646 = vtanh.f32 %v396_v3 }
 0xaa3   :  { %v647_v4 = vpop.eup %646 }
 0xaa4   :  { %399 = vrot.lane.b32.xlu2 %v647_v4, %s739_s3 }
 0xafe   :  { %v400_v10 = vpop.permute.xlu2 %399 }
 0xaff   :  { %v402_v11 = vmul.f32 %v400_v10, %v385_v62  ;;  %v527_v10 = vperm.slane %v509_v1, 2 }
 0xb01   :  { %417 = vperm.xlu2 %606, %v402_v11   ;;  %412 = vperm.xlu1 %610, %v402_v11  }
 0xb02   :  { %407 = vperm.xlu0 %609, %v402_v11  }
 0xb09   :  { %612 = vset.pattern.permute.xlu2 %v744_v39  ;;  %611 = vset.pattern.permute.xlu1 %v740_v33 }
 0xb0a   :  { %427 = vperm.xlu2 %612, %v402_v11   ;;  %422 = vperm.xlu1 %611, %v402_v11   ;;  %v539_v11 = vperm.slane %v509_v1, 4 }
 0xb12   :  { %614 = vset.pattern.permute.xlu2 %v743_v38  ;;  %613 = vset.pattern.permute.xlu1 %v741_v34  ;;  %v404_v38 = vld [vmem:[#allocation2 + $0xc] sm:$0x3] }
 0xb5b   :  { %v418_v12 = vpop.permute.xlu2 %417 }
 0xb5c   :  { %v420_v20 = vmul.f32 %v418_v12, %v800_v8  ;;  %v533_v12 = vperm.slane %v509_v1, 3 }
 0xb64   :  { %v428_v15 = vpop.permute.xlu2 %427 }
 0xb65   :  { %v430_v21 = vmul.f32 %v428_v15, %v810_v16 }
 0xb67   :  { %v433_v6 = vadd.f32 %v430_v21, %v404_v38 }
 0xb73   :  { %v413_v13 = vpop.permute.xlu1 %412 }
 0xb74   :  { %v408_v14 = vpop.permute.xlu0 %407  ;;  %v415_v17 = vmul.f32 %v413_v13, %v798_v7 }
 0xb75   :  { %v410_v18 = vmul.f32 %v408_v14, %v791_v5 }
 0xb77   :  { %v431_v23 = vadd.f32 %v415_v17, %v410_v18 }
 0xb7c   :  { %v423_v19 = vpop.permute.xlu1 %422 }
 0xb7d   :  { %v425_v22 = vmul.f32 %v423_v19, %v802_v9 }
 0xb7f   :  { %v432_v24 = vadd.f32 %v425_v22, %v420_v20 }
 0xb81   :  { %v434_v25 = vadd.f32 %v432_v24, %v431_v23 }
 0xb83   :  { %v435_v26 = vadd.f32 %v434_v25, %v433_v6 }
 0xb85   :  { %648 = vtanh.f32 %v435_v26 }
 0xb8b   :  { %v649_v27 = vpop.eup %648 }
 0xb8c   :  { %441 = vrot.lane.b32.xlu0 %v649_v27, %s738_s2  ;;  %v437_v28 = vmul.f32 0.5, %v649_v27 }
 0xb8e   :  { %v438_v29 = vadd.f32 0.5, %v437_v28 }
 0xb90   :  { %v439_v32 = vmul.f32 %v438_v29, %v396_v3  ;;  %v515_v3 = vperm.slane %v509_v1, 0 }
 0xbfe   :  { %v442_v30 = vpop.permute.xlu0 %441 }
 0xbff   :  { %v444_v31 = vmul.f32 %v442_v30, %v438_v29 }
 0xc01   :  { %446 = vrot.lane.b32.xlu1 %v444_v31, %s739_s3 }
 0xc73   :  { %v447_v36 = vpop.permute.xlu1 %446 }
 0xc74   :  { %v449_v37 = vadd.f32 %v447_v36, %v439_v32 }
 0xc76   :  { %650 = vtanh.f32 %v449_v37 }
 0xc7c   :  { %v651_v40 = vpop.eup %650 }
 0xc7d   :  { %452 = vrot.lane.b32.xlu2 %v651_v40, %s739_s3 }
 0xcd7   :  { %v453_v41 = vpop.permute.xlu2 %452 }
 0xcd8   :  { %v455_v42 = vmul.f32 %v453_v41, %v438_v29 }
 0xcda   :  { %470 = vperm.xlu2 %614, %v455_v42   ;;  %465 = vperm.xlu1 %613, %v455_v42  }
 0xcdb   :  { %460 = vperm.xlu0 %609, %v455_v42  }
 0xce2   :  { %616 = vset.pattern.permute.xlu1 %v744_v39 }
 0xce3   :  { %615 = vset.pattern.permute.xlu0 %v740_v33  ;;  %480 = vperm.xlu1 %616, %v455_v42  }
 0xce4   :  { %475 = vperm.xlu0 %615, %v455_v42  }
 0xceb   :  { %618 = vset.pattern.permute.xlu1 %v741_v34  ;;  %v457_v34 = vld [vmem:[#allocation2 + $0xe] sm:$0x3] }
 0xcec   :  { %617 = vset.pattern.permute.xlu0 %v742_v35 }
 0xd34   :  { %v471_v45 = vpop.permute.xlu2 %470 }
 0xd35   :  { %v473_v50 = vmul.f32 %v471_v45, %v800_v8 }
 0xd4c   :  { %v466_v43 = vpop.permute.xlu1 %465 }
 0xd4d   :  { %v461_v44 = vpop.permute.xlu0 %460  ;;  %v468_v46 = vmul.f32 %v466_v43, %v798_v7 }
 0xd4e   :  { %v463_v47 = vmul.f32 %v461_v44, %v791_v5 }
 0xd50   :  { %v484_v53 = vadd.f32 %v468_v46, %v463_v47 }
 0xd55   :  { %v481_v48 = vpop.permute.xlu1 %480 }
 0xd56   :  { %v476_v49 = vpop.permute.xlu0 %475  ;;  %v483_v51 = vmul.f32 %v481_v48, %v810_v16 }
 0xd57   :  { %v478_v52 = vmul.f32 %v476_v49, %v802_v9 }
 0xd58   :  { %v486_v55 = vadd.f32 %v483_v51, %v457_v34 }
 0xd59   :  { %v485_v54 = vadd.f32 %v478_v52, %v473_v50 }
 0xd5b   :  { %v487_v35 = vadd.f32 %v485_v54, %v484_v53 }
 0xd5d   :  { %v488_v56 = vadd.f32 %v487_v35, %v486_v55 }
 0xd5f   :  { %652 = vtanh.f32 %v488_v56 }
 0xd65   :  { %v653_v57 = vpop.eup %652 }
 0xd66   :  { %494 = vrot.lane.b32.xlu2 %v653_v57, %s738_s2  ;;  %v490_v7 = vmul.f32 0.5, %v653_v57 }
 0xd68   :  { %v491_v5 = vadd.f32 0.5, %v490_v7 }
 0xd6a   :  { %v492_v8 = vmul.f32 %v491_v5, %v449_v37 }
 0xdc0   :  { %v495_v58 = vpop.permute.xlu2 %494 }
 0xdc1   :  { %v497_v59 = vmul.f32 %v495_v58, %v491_v5 }
 0xdc3   :  { %499 = vrot.lane.b32.xlu1 %v497_v59, %s739_s3 }
 0xe35   :  { %v500_v16 = vpop.permute.xlu1 %499 }
 0xe36   :  { %v502_v60 = vadd.f32 %v500_v16, %v492_v8 }
 0xe38   :  { %654 = vtanh.f32 %v502_v60 }
 0xe3e   :  { %v655_v9 = vpop.eup %654 }
 0xe3f   :  { %505 = vrot.lane.b32.xlu2 %v655_v9, %s739_s3 }
 0xe99   :  { %v506_v61 = vpop.permute.xlu2 %505 }
 0xe9a   :  { %v508_v62 = vmul.f32 %v506_v61, %v491_v5 }
 0xe9c   :  { %524 = vperm.xlu2 %614, %v508_v62   ;;  %518 = vperm.xlu1 %618, %v508_v62  }
 0xe9d   :  { %512 = vperm.xlu0 %617, %v508_v62  }
 0xea4   :  { %620 = vset.pattern.permute.xlu2 %v744_v39  ;;  %619 = vset.pattern.permute.xlu1 %v740_v33 }
 0xea5   :  { %536 = vperm.xlu2 %620, %v508_v62   ;;  %530 = vperm.xlu1 %619, %v508_v62  }
 0xea6   :  { %621 = vset.pattern.permute.xlu0 %v744_v39  ;;  %v623_v39 = vld [vmem:[%s923_s5] ss:$0 sm:$0xff] }
 0xef6   :  { %v525_v63 = vpop.permute.xlu2 %524 }
 0xef7   :  { %v528_v17 = vmul.f32 %v527_v10, %v525_v63 }
 0xeff   :  { %v537_v13 = vpop.permute.xlu2 %536 }
 0xf00   :  { %v540_v18 = vmul.f32 %v539_v11, %v537_v13 }
 0xf02   :  { %v547_v22 = vadd.f32 %v623_v39, %v540_v18 }
 0xf0e   :  { %v519_v0 = vpop.permute.xlu1 %518 }
 0xf0f   :  { %v513_v4 = vpop.permute.xlu0 %512  ;;  %v522_v14 = vmul.f32 %v521_v2, %v519_v0 }
 0xf10   :  { %v516_v15 = vmul.f32 %v515_v3, %v513_v4 }
 0xf12   :  { %v542_v20 = vadd.f32 %v522_v14, %v516_v15 }
 0xf17   :  { %v531_v33 = vpop.permute.xlu1 %530 }
 0xf18   :  { %v534_v19 = vmul.f32 %v533_v12, %v531_v33 }
 0xf1a   :  { %v543_v21 = vadd.f32 %v534_v19, %v528_v17 }
 0xf1c   :  { %v548_v23 = vadd.f32 %v543_v21, %v542_v20 }
 0xf1e   :  { %v549_v24 = vadd.f32 %v548_v23, %v547_v22 }
 0xf20   :  { %551 = vst.msk [vmem:[#allocation8] sm:$0x3] %vm550_vm2, %v549_v24 }
 0xf21   :  { %562 = dma.vmem_to_hbm [thread:$0]  %s558_s15, 32, %s560_s18, [#allocation5]  }
 0xf22   :  { %732 = dma.done.wait [#allocation5], 32  }
 0xf23   :  { %733 = vsyncadd [#allocation5], 4294967264 }
 0xf24   :  { %567 = vsyncpa [#allocation4], 1 }
 0xf25   :  { %568 = vsyncpa [#allocation7], 1 }
 0xf26   :  { %569 = vsyncpa [#allocation5], 1 }

</bundles_post_ra>
